<compile_context>
chip_gen: v6e
topology: v6e:2x2x1
jax: 0.10.0
libtpu: 0.0.40
codegen_flags: <defaults>
</compile_context>

<pallas_src>
import jax
import jax.numpy as jnp
from jax import lax
from jax.experimental import pallas as pl
from jax.experimental.pallas import tpu as pltpu

EPS = 1e-8


# ---------------------------------------------------------------------------
# Kernel 1: hoisted question branch   q_fa = relu(q @ wq + bq)   -> [B, H] f32
# ---------------------------------------------------------------------------
def _q_branch_kernel(q_ref, wq_ref, bq_ref, qfa_ref):
    acc = jnp.dot(q_ref[...], wq_ref[...], preferred_element_type=jnp.float32)
    qfa_ref[...] = jnp.maximum(acc + bq_ref[...], 0.0)


# ---------------------------------------------------------------------------
# Kernel 2: image branch + modal combine + transform + softmax / mask / renorm
#   grid = (B // Bt, H // TH)
#     axis 0: batch tiles       ("parallel")
#     axis 1: hidden-dim chunks ("arbitrary", reduction into VMEM accumulator)
# ---------------------------------------------------------------------------
def _attention_kernel(img_ref, qfa_ref, locs_ref, wi_ref, bi_ref, wt_ref, bt_ref,
                      out_ref, acc_ref):
    h = pl.program_id(1)
    bt_tile, num_loc, _ = img_ref.shape
    n_att = out_ref.shape[-1]

    @pl.when(h == 0)
    def _init():
        acc_ref[...] = jnp.zeros_like(acc_ref)

    # [Bt*L, Di] x [Di, TH] on the MXU (bf16 in, f32 accumulate), bias + relu in f32.
    img = img_ref[...].reshape(bt_tile * num_loc, -1)
    img_fa = jnp.maximum(
        jnp.dot(img, wi_ref[...], preferred_element_type=jnp.float32) + bi_ref[...],
        0.0)                                                     # [Bt*L, TH] f32

    # Modal combine: hoisted question features broadcast over locations.
    q_fa = qfa_ref[...]                                          # [Bt, TH] f32
    joint = img_fa.reshape(bt_tile, num_loc, -1) * q_fa[:, None, :]
    joint = joint.reshape(bt_tile * num_loc, -1).astype(wt_ref.dtype)

    # Transform -> accumulate raw attention logits over H chunks.
    acc_ref[...] += jnp.dot(joint, wt_ref[...], preferred_element_type=jnp.float32)

    @pl.when(h == pl.num_programs(1) - 1)
    def _finalize():
        raw = acc_ref[...].reshape(bt_tile, num_loc, n_att) + bt_ref[...]

        # softmax over locations (dim=1 of [B, L, A])
        m = jnp.max(raw, axis=1, keepdims=True)
        e = jnp.exp(raw - m)
        attn = e * pl.reciprocal(jnp.sum(e, axis=1, keepdims=True), approx=True)

        # TopDownAttention._mask_attentions: zero out locations >= image_locs[b]
        row_ids = lax.broadcasted_iota(jnp.int32, (bt_tile, num_loc, n_att), 1)
        locs = locs_ref[...].reshape(bt_tile, 1, 1)
        masked = jnp.where(row_ids >= locs, 0.0, attn)

        # renormalize with the (sum == 0) + EPS fallback of the reference.
        s = jnp.sum(masked, axis=1, keepdims=True)
        s = s + (s == 0.0).astype(jnp.float32) + EPS
        # Exact division here (tiny [Bt,1,A] op) keeps the EPS-renorm semantics
        # numerically tight; the softmax reciprocal above is the approx/EUP one.
        out_ref[...] = (masked / s).astype(out_ref.dtype)
        # NOTE on lane density: A (#glimpses) is tiny, but the attention output
        # is <0.1% of the bytes moved for the image features, so the lane-sparse
        # store is negligible; a transposed [B, A, L] output layout was judged
        # not worth the extra in-kernel + wrapper transposes.


# ---------------------------------------------------------------------------
# Block-size heuristics
# ---------------------------------------------------------------------------
def _pick_block_b(batch, num_loc, target_rows=256):
    """Batch tile Bt: divides B, 8-aligned (or == B), Bt*L near the MXU M tile."""
    best = None
    for cand in range(1, batch + 1):
        if batch % cand:
            continue
        if cand != batch and cand % 8:
            continue  # keep second-minor block dims sublane (8) aligned
        if best is None or abs(cand * num_loc - target_rows) < abs(best * num_loc - target_rows):
            best = cand
    return best if best is not None else batch


def _pick_block_h(hidden):
    for cand in (512, 256, 128):
        if hidden % cand == 0:
            return cand
    return hidden  # full (exempt from the (8,128) block constraint)


# ---------------------------------------------------------------------------
# Wrapper
# ---------------------------------------------------------------------------
def attention_layer(image_feat, question_embedding, image_locs, params,
                    *, block_b=None, block_h=None, compute_dtype=jnp.bfloat16):
    B, L, Di = image_feat.shape
    Dq = question_embedding.shape[-1]
    H = params["wi"].shape[1]
    A = params["wt"].shape[1]

    Bt = block_b if block_b is not None else _pick_block_b(B, L)
    TH = block_h if block_h is not None else _pick_block_h(H)
    assert B % Bt == 0, (B, Bt)
    assert H % TH == 0, (H, TH)

    # bf16 matmul operands, f32 accumulation; biases stay f32.
    img = image_feat.astype(compute_dtype)
    q = question_embedding.astype(compute_dtype)
    wi = params["wi"].astype(compute_dtype)
    wq = params["wq"].astype(compute_dtype)
    wt = params["wt"].astype(compute_dtype)
    bi = params["bi"].astype(jnp.float32)
    bq = params["bq"].astype(jnp.float32)
    bt = params["bt"].astype(jnp.float32)
    locs2d = image_locs.astype(jnp.int32).reshape(B, 1)

    # ---- hoisted question branch: one batched [B, Dq] x [Dq, H] matmul ----
    q_fa = pl.pallas_call(
        _q_branch_kernel,
        out_shape=jax.ShapeDtypeStruct((B, H), jnp.float32),
        grid_spec=pltpu.PrefetchScalarGridSpec(
            num_scalar_prefetch=0,
            grid=(H // TH,),
            in_specs=[
                pl.BlockSpec((B, Dq), lambda h: (0, 0)),
                pl.BlockSpec((Dq, TH), lambda h: (0, h)),
                pl.BlockSpec((1, TH), lambda h: (0, h)),
            ],
            out_specs=pl.BlockSpec((B, TH), lambda h: (0, h)),
        ),
        compiler_params=pltpu.CompilerParams(
            dimension_semantics=("parallel",),
            vmem_limit_bytes=64 << 20),
        cost_estimate=pl.CostEstimate(
            flops=2 * B * Dq * H,
            transcendentals=0,
            bytes_accessed=B * Dq * 2 + Dq * H * 2 + H * 4 + B * H * 4),
    )(q, wq, bq)

    # ---- main attention kernel: (batch tiles) x (hidden chunks) ----
    out = pl.pallas_call(
        _attention_kernel,
        out_shape=jax.ShapeDtypeStruct((B, L, A), jnp.float32),
        grid_spec=pltpu.PrefetchScalarGridSpec(
            num_scalar_prefetch=0,
            grid=(B // Bt, H // TH),
            in_specs=[
                pl.BlockSpec((Bt, L, Di), lambda i, h: (i, 0, 0)),   # image feats
                pl.BlockSpec((Bt, TH),    lambda i, h: (i, h)),      # hoisted q_fa
                pl.BlockSpec((Bt, 1),     lambda i, h: (i, 0)),      # image_locs
                pl.BlockSpec((Di, TH),    lambda i, h: (0, h)),      # wi chunk
                pl.BlockSpec((1, TH),     lambda i, h: (0, h)),      # bi chunk
                pl.BlockSpec((TH, A),     lambda i, h: (h, 0)),      # wt chunk
                pl.BlockSpec((1, A),      lambda i, h: (0, 0)),      # bt
            ],
            out_specs=pl.BlockSpec((Bt, L, A), lambda i, h: (i, 0, 0)),
            scratch_shapes=[pltpu.VMEM((Bt * L, A), jnp.float32)],
        ),
        compiler_params=pltpu.CompilerParams(
            dimension_semantics=("parallel", "arbitrary"),
            vmem_limit_bytes=64 << 20),
        cost_estimate=pl.CostEstimate(
            flops=2 * B * L * Di * H + 2 * B * L * H * A,
            transcendentals=B * L * A,
            bytes_accessed=(B * L * Di * 2 + B * H * 4 + B * 4
                            + Di * H * 2 + H * 4 + H * A * 2 + A * 4
                            + B * L * A * 4)),
    )(img, q_fa, locs2d, wi, bi, wt, bt)
    return out


# ---------------------------------------------------------------------------
# Pure-JAX reference mirroring the PyTorch forward semantics (same bf16 casts).
# ---------------------------------------------------------------------------
def attention_layer_ref(image_feat, question_embedding, image_locs, params,
                        compute_dtype=jnp.bfloat16):
    B, L, Di = image_feat.shape
    wi = params["wi"].astype(compute_dtype)
    wq = params["wq"].astype(compute_dtype)
    wt = params["wt"].astype(compute_dtype)
    bi = params["bi"].astype(jnp.float32)
    bq = params["bq"].astype(jnp.float32)
    bt = params["bt"].astype(jnp.float32)
    H = wi.shape[1]

    img = image_feat.astype(compute_dtype).reshape(B * L, Di)
    q = question_embedding.astype(compute_dtype)

    img_fa = jnp.maximum(jnp.dot(img, wi, preferred_element_type=jnp.float32) + bi, 0.0)
    q_fa = jnp.maximum(jnp.dot(q, wq, preferred_element_type=jnp.float32) + bq, 0.0)
    joint = img_fa.reshape(B, L, H) * q_fa[:, None, :]
    raw = jnp.dot(joint.astype(compute_dtype).reshape(B * L, H), wt,
                  preferred_element_type=jnp.float32) + bt
    raw = raw.reshape(B, L, -1)

    m = jnp.max(raw, axis=1, keepdims=True)
    e = jnp.exp(raw - m)
    attn = e / jnp.sum(e, axis=1, keepdims=True)

    rows = jnp.arange(L, dtype=jnp.int32)[None, :, None]
    mask = rows >= image_locs.astype(jnp.int32)[:, None, None]
    masked = jnp.where(mask, 0.0, attn)
    s = jnp.sum(masked, axis=1, keepdims=True)
    s = s + (s == 0.0).astype(jnp.float32) + EPS
    return masked / s


if __name__ == "__main__":
    key = jax.random.PRNGKey(0)
    # Small shapes that still exercise both grid axes:
    #   batch tile Bt = 8 -> Bt*L = 256 MXU rows; H tiled in 2 chunks of 128.
    B, L, Di, Dq, H, A = 16, 32, 128, 64, 256, 2

    ks = jax.random.split(key, 8)
    image_feat = jax.random.normal(ks[0], (B, L, Di), dtype=jnp.float32)
    question_embedding = jax.random.normal(ks[1], (B, Dq), dtype=jnp.float32)
    image_locs = jax.random.randint(ks[2], (B,), minval=L // 2, maxval=L + 1).astype(jnp.int32)

    params = {
        "wi": 0.05 * jax.random.normal(ks[3], (Di, H), dtype=jnp.float32),
        "bi": 0.05 * jax.random.normal(ks[4], (1, H), dtype=jnp.float32),
        "wq": 0.05 * jax.random.normal(ks[5], (Dq, H), dtype=jnp.float32),
        "bq": 0.05 * jax.random.normal(ks[6], (1, H), dtype=jnp.float32),
        "wt": 0.05 * jax.random.normal(ks[7], (H, A), dtype=jnp.float32),
        "bt": jnp.zeros((1, A), dtype=jnp.float32),
    }

    out = attention_layer(image_feat, question_embedding, image_locs, params,
                          block_h=128)
    out = jax.block_until_ready(out)

    ref = attention_layer_ref(image_feat, question_embedding, image_locs, params)
    assert out.shape == (B, L, A)
    max_err = float(jnp.max(jnp.abs(out - ref)))
    assert jnp.allclose(out, ref, atol=1e-3, rtol=1e-3), f"mismatch vs reference (max abs err={max_err})"

    print("KERNEL_OK")
</pallas_src>

<mosaic_0001>
module attributes {stable_mosaic.version = 11 : i64} {
  func.func @_q_branch_kernel(%arg0: i32, %arg1: memref<16x64xbf16, #tpu.memory_space<vmem>>, %arg2: memref<64x128xbf16, #tpu.memory_space<vmem>>, %arg3: memref<1x128xf32, #tpu.memory_space<vmem>>, %arg4: memref<16x128xf32, #tpu.memory_space<vmem>>) attributes {dimension_semantics = [#tpu.dimension_semantics<parallel>], iteration_bounds = array<i64: 2>, scalar_prefetch = 0 : i64, scratch_operands = 0 : i64, tpu.core_type = #tpu.core_type<tc>, window_params = [{pipeline_mode = #tpu.pipeline_mode<synchronous>, transform_indices = @transform_0, window_bounds = array<i64: 16, 64>}, {transform_indices = @transform_1, window_bounds = array<i64: 64, 128>}, {transform_indices = @transform_2, window_bounds = array<i64: 1, 128>}, {transform_indices = @transform_3, window_bounds = array<i64: 16, 128>}]} {
    %c0 = arith.constant 0 : index
    %c0_0 = arith.constant 0 : index
    %0 = vector.load %arg1[%c0, %c0_0] : memref<16x64xbf16, #tpu.memory_space<vmem>>, vector<16x64xbf16>
    %c0_1 = arith.constant 0 : index
    %c0_2 = arith.constant 0 : index
    %1 = vector.load %arg2[%c0_1, %c0_2] : memref<64x128xbf16, #tpu.memory_space<vmem>>, vector<64x128xbf16>
    %cst = arith.constant dense<0.000000e+00> : vector<16x128xf32>
    %2 = tpu.matmul %0, %1, %cst {dimension_numbers = #tpu.dot_dimension_numbers<[1], [0], [0], [1], [0, 0, 1, 1], [], []>} : vector<16x64xbf16>, vector<64x128xbf16>, vector<16x128xf32> -> vector<16x128xf32>
    %c0_3 = arith.constant 0 : index
    %c0_4 = arith.constant 0 : index
    %3 = vector.load %arg3[%c0_3, %c0_4] : memref<1x128xf32, #tpu.memory_space<vmem>>, vector<1x128xf32>
    %4 = vector.broadcast %3 : vector<1x128xf32> to vector<16x128xf32>
    %5 = arith.addf %2, %4 : vector<16x128xf32>
    %cst_5 = arith.constant 0.000000e+00 : f32
    %6 = vector.broadcast %cst_5 : f32 to vector<16x128xf32>
    %7 = arith.maximumf %5, %6 : vector<16x128xf32>
    %c0_6 = arith.constant 0 : index
    %c0_7 = arith.constant 0 : index
    %8 = vector.load %arg4[%c0_6, %c0_7] : memref<16x128xf32, #tpu.memory_space<vmem>>, vector<16x128xf32>
    tpu.vector_store %arg4[%c0_6, %c0_7], %7 {strides = array<i32>} : memref<16x128xf32, #tpu.memory_space<vmem>>, vector<16x128xf32>,
    return
  }
  func.func @transform_0(%arg0: i32) -> (i32, i32) {
    %c0_i32 = arith.constant 0 : i32
    %c0_i32_0 = arith.constant 0 : i32
    %c0_i32_1 = arith.constant 0 : i32
    return %c0_i32, %c0_i32_0 : i32, i32
  }
  func.func @transform_1(%arg0: i32) -> (i32, i32) {
    %c0_i32 = arith.constant 0 : i32
    %c0_i32_0 = arith.constant 0 : i32
    return %c0_i32, %arg0 : i32, i32
  }
  func.func @transform_2(%arg0: i32) -> (i32, i32) {
    %c0_i32 = arith.constant 0 : i32
    %c0_i32_0 = arith.constant 0 : i32
    return %c0_i32, %arg0 : i32, i32
  }
  func.func @transform_3(%arg0: i32) -> (i32, i32) {
    %c0_i32 = arith.constant 0 : i32
    %c0_i32_0 = arith.constant 0 : i32
    return %c0_i32, %arg0 : i32, i32
  }
}

</mosaic_0001>

<bundles_post_ra>
// kernel: tpu_custom_call.1
= control target key start
LH: loop header
LB: loop body
LE: loop exit
PB: predicated region body
PF: predicated region fallthrough
CT: control target
= control target key end

     0   :  { %8 = vsyncpa [#allocation3], 0  ;;  %s877_s0 = inlined_call_operand.hbm [shape: bf16[16,64], index: 0, kind: input, shape index: {}]   ;;  %s878_s1 = inlined_call_operand.hbm [shape: bf16[64,256], index: 1, kind: input, shape index: {}]   ;;  %s879_s2 = inlined_call_operand.vmem [shape: f32[1,256], index: 2, kind: input, shape index: {}]   ;;  %s880_s3 = inlined_call_operand.hbm [shape: f32[16,256], index: 3, kind: output, shape index: {}]  }
   0x1   :  { %9 = vsyncpa [#allocation6], 0 }
   0x2   :  { %11 = vsyncpa [#allocation6 + $0x1], 0 }
   0x3   :  { %12 = vsyncpa [#allocation4], 0 }
   0x4   :  { %14 = vsyncpa [#allocation4 + $0x1], 0  ;;  %s683_s12 = smov 0   ;;  %s685_s13 = smov 0  }
   0x5   :  { %s687_s14 = smov 0   ;;  %s689_s15 = smov 0  }
   0x6 LB: > { %s704_s16 = sadd.s32 4294967295, %s650_s15   ;;  %s420_s17 = sadd.s32 4294967294, %s650_s15   ;;  %s650_s15 = sphi %s689_s15, %s902_s15   ;;  %s646_s14 = sphi %s687_s14, %s901_s14   ;;  %s642_s13 = sphi %s685_s13, %s900_s13   ;;  %s638_s12 = sphi %s683_s12, %s899_s12  }
   0x7   : > { %s708_s18 = sadd.s32 1, %s650_s15   ;;  %s48_s19 = sadd.s32 1, %s646_s14 }
   0x8   : > { %s45_s20 = ssub.s32 %s650_s15, %s708_s18  ;;  %p55_p0 = scmp.ne.s32.totalorder %s646_s14, %s642_s13 }
   0x9   : > { %p46_p1 = scmp.eq.s32.totalorder %s45_s20, 0  ;;  %p56_p2 = scmp.eq.s32.totalorder %s650_s15, 0 }
   0xa   : > { %p61_p3 = scmp.ne.s32.totalorder %s642_s13, %s638_s12  ;;  %p884_p4 = scmp.eq.s32.totalorder %s704_s16, 0 }
   0xb   : > { %s720_s21 = scalar_select %p46_p1, %s646_s14, %s48_s19  }
   0xc   : > { %p722_p5 = por %p56_p2, %p55_p0  ;;  %p728_p6 = por %p884_p4, %p61_p3 }
   0xd   : > { %p111_p7 = scmp.eq.s32.totalorder %s704_s16, 1  ;;  %p117_p8 = scmp.eq.s32.totalorder %s420_s17, 1 }
   0xe   : > { %s886_s23 = scalar_select %p728_p6, 1, 0 }
   0xf   : > { %p421_p9 = scmp.ge.s32.totalorder %s650_s15, 1  ;;  %p124_p10 = scmp.lt.s32.totalorder %s650_s15, 3 }
  0x10   : > { %p735_p11 = por %p111_p7, %p55_p0  ;;  %p739_p12 = por %p117_p8, %p61_p3 }
  0x11   : > { %p743_p13 = pnand %p421_p9, %p124_p10  ;;  %s652_s27 = smov [#allocation2]  }
  0x12   : > { %s887_s24 = scalar_select %p735_p11, 1, 0 }
  0x13   : > { %s888_s25 = scalar_select %p739_p12, 1, 0 }
  0x14   : > { %s889_s26 = scalar_select %p743_p13, 1, 0 }
  0x15   : > { %p466_p1 = pneg %p743_p13  ;;  %s136_s28 = sshll.u32 %s652_s27, 4  ;;  %s137_s28 = int_to_ptr.vmem [resolvable:$true] %s136_s28 }
  0x16   : > { %p479_p3 = scmp.lt.s32.totalorder %s650_s15, 2  ;;  %s150_s30 = sand.u32 1, %s646_s14  }
  0x17   : > { %p751_p2 = pnand %p466_p1, %p884_p4  ;;  %s539_s4 = scalar_lea.vmem %s137_s28, 128 }
  0x18   : > { %p540_p8 = scmp.ne.s32.totalorder %s137_s28, %s539_s4  ;;  %p547_p12 = scmp.lt.s32.totalorder %s137_s28, %s137_s28 }
  0x19   : > { %p530_p7 = pneg %p751_p2  ;;  %p548_p11 = scmp.lt.s32.totalorder %s539_s4, %s539_s4 }
  0x1b   : > { %p542_p9 = pnand %p540_p8, %p530_p7  ;;  %p549_p6 = por %p548_p11, %p547_p12 }
  0x1d   : > { %p543_p10 = pneg %p542_p9 }
  0x1f   : > { %p550_p13 = pnand %p549_p6, %p543_p10 }
  0x21   : > { %553 = shalt.err (!%p550_p13)
}
  0x22   : > { %s653_s5 = smov 64   ;;  %s654_s6 = smov 4  }
  0x23   : > { %469 = dma.hbm_to_vmem [thread:$0]  (!%p751_p2), %s877_s0, 128, %s137_s28, [#allocation3], %s653_s5, %s653_s5, %s654_s6  }
  0x24   : > { %p772_p1 = pnand %p479_p3, %p722_p5  ;;  %s424_s10 = sshll.u32 %s150_s30, 5 }
  0x25   : > { %s425_s11 = sshll.u32 %s650_s15, 6  ;;  %s154_s27 = scalar_lea.vmem [#allocation5], %s424_s10 }
  0x26   : > { %s780_s20 = scalar_lea.hbm %s878_s1, %s425_s11  ;;  %s160_s29 = sshll.u32 %s154_s27, 4  ;;  %s782_s29 = int_to_ptr.vmem [resolvable:$true] %s160_s29 }
  0x27   : > { %s784_s22 = scalar_lea.sflag [#allocation6], %s150_s30  ;;  %s554_s28 = scalar_lea.hbm %s780_s20, 512 }
  0x28   : > { %p555_p5 = scmp.ne.s32.totalorder %s780_s20, %s554_s28  ;;  %p556_p6 = pneg %p772_p1 }
  0x29   : > { %s559_s8 = scalar_lea.hbm %s878_s1, 1024  ;;  %p560_p13 = scmp.lt.s32.totalorder %s780_s20, %s878_s1 }
  0x2a   : > { %p557_p11 = pnand %p556_p6, %p555_p5  ;;  %p561_p2 = scmp.lt.s32.totalorder %s559_s8, %s554_s28 }
  0x2c   : > { %p558_p12 = pneg %p557_p11  ;;  %p562_p3 = por %p561_p2, %p560_p13 }
  0x2e   : > { %p563_p7 = pnand %p562_p3, %p558_p12 }
  0x30   : > { %566 = shalt.err (!%p563_p7)
}
  0x31   : > { %s567_s30 = scalar_lea.vmem %s782_s29, 512  ;;  %s655_s10 = smov [#allocation5]  }
  0x32   : > { %p568_p8 = scmp.ne.s32.totalorder %s782_s29, %s567_s30  ;;  %s572_s19 = sshll.u32 %s655_s10, 4  ;;  %s573_s19 = int_to_ptr.vmem [resolvable:$false] %s572_s19 }
  0x33   : > { %s574_s27 = scalar_lea.vmem %s573_s19, 1024  ;;  %p575_p5 = scmp.lt.s32.totalorder %s782_s29, %s573_s19 }
  0x34   : > { %p570_p9 = pnand %p568_p8, %p556_p6  ;;  %p576_p11 = scmp.lt.s32.totalorder %s574_s27, %s567_s30 }
  0x36   : > { %p571_p10 = pneg %p570_p9  ;;  %p577_p0 = por %p576_p11, %p575_p5 }
  0x38   : > { %p578_p4 = pnand %p577_p0, %p571_p10 }
  0x3a   : > { %581 = shalt.err (!%p578_p4)
}
  0x3b   : > { %s656_s28 = smov 128   ;;  %p892_p6 = scmp.ne.s32.totalorder %s889_s26, 0 }
  0x3c   : > { %473 = dma.hbm_to_vmem [thread:$0]  (!%p772_p1), %s780_s20, 512, %s782_s29, %s784_s22, %s656_s28, %s653_s5, %s654_s6  }
  0x3d   : > { %178 = sbr.rel (%p892_p6) target bundleno = 304 (0x130), region = 32  ;;  %p893_p12 = scmp.eq.s32.totalorder (!%p892_p6), %s704_s16, 0 }
  0x42   : > { %625 = dma.done.wait (%p893_p12), [#allocation3], 128   ;;  %p894_p13 = pmov %p893_p12 }
  0x43   : > { %s814_s4 = sand.u32 1, %s642_s13   ;;  %p895_p4 = scmp.ne.s32.totalorder %s886_s23, 0 }
  0x44   : > { %627 = vsyncadd (%p894_p13), [#allocation3], 4294967168  ;;  %s428_s9 = sshll.u32 %s814_s4, 5  ;;  %s185_s7 = scalar_lea.sflag [#allocation6], %s814_s4 }
  0x45   : > { %s188_s8 = scalar_lea.vmem [#allocation5], %s428_s9 }
  0x46   : > { %629 = dma.done.wait (%p895_p4), %s185_s7, 512  }
  0x47   : > { %631 = vsyncadd (%p895_p4), %s185_s7, 4294966784  ;;  %v657_v0 = vmov 0.0   ;;  %vm658_vm0 = vmmov 0   ;;  %v523_v1 = vld [vmem:[%s188_s8 + $0x18] sm:$0xff]   ;;  %v524_v2 = vld [vmem:[%s188_s8 + $0x10] sm:$0xff]   ;;  %vm264_vm1 = vcmask 523264  }
  0x48   : > { %446 = vmatprep.subr.bf16.mxu0 %v657_v0  ;;  %454 = vmatprep.mubr.msk.bf16.mxu0 %vm658_vm0, %v657_v0  ;;  %v525_v3 = vld [vmem:[%s188_s8 + $0x8] sm:$0xff]   ;;  %v526_v4 = vld [vmem:[%s188_s8] sm:$0xff]   ;;  %v527_v5 = vld [vmem:[#allocation2] sm:$0xff]   ;;  %p214_p0 = scmp.lt.s32.totalorder %s704_s16, 1  ;;  %s429_s20 = sshll.u32 %s814_s4, 4 }
  0x49   : > { %447 = vmatpush3.bf16.msra.mxu0 %v523_v1  ;;  %s213_s29 = scalar_lea.vmem [#allocation7], %s429_s20  ;;  %s438_s11 = sshll.u32 %s704_s16, 7 }
  0x4a   : > { %448 = vmatprep.subr.bf16.mxu0 %v657_v0  ;;  %s215_s23 = scalar_select %p214_p0, %s704_s16, 1 }
  0x4b   : > { %s326_s22 = sshll.u32 %s213_s29, 4  ;;  %s834_s10 = scalar_lea.hbm %s880_s3, %s438_s11  ;;  %s829_s22 = int_to_ptr.vmem [resolvable:$true] %s326_s22 }
  0x4c   : > { %s216_s6 = scalar_lea.vmem %s879_s2, %s215_s23  ;;  %s314_s19 = scalar_lea.sflag [#allocation4], %s814_s4 }
  0x4d   : > { %449 = vmatpush3.bf16.msra.mxu0 %v524_v2  ;;  %v430_v6 = vld [vmem:[%s216_s6] ss:$0 sm:$0xff]  ;;  %s582_s27 = scalar_lea.vmem %s829_s22, 256  ;;  %p896_p2 = scmp.ne.s32.totalorder %s887_s24, 0 }
  0x4e   : > { %450 = vmatprep.subr.bf16.mxu0 %v657_v0  ;;  %p583_p1 = scmp.ne.s32.totalorder %s829_s22, %s582_s27  ;;  %s659_s16 = smov [#allocation7]  }
  0x4f   : > { %s586_s28 = sshll.u32 %s659_s16, 4  ;;  %s587_s28 = int_to_ptr.vmem [resolvable:$false] %s586_s28 }
  0x50   : > { %p584_p3 = pnand %p583_p1, %p896_p2  ;;  %s588_s9 = scalar_lea.vmem %s587_s28, 512 }
  0x51   : > { %451 = vmatpush3.bf16.msra.mxu0 %v525_v3  ;;  %p589_p8 = scmp.lt.s32.totalorder %s829_s22, %s587_s28  ;;  %p590_p9 = scmp.lt.s32.totalorder %s588_s9, %s582_s27 }
  0x52   : > { %452 = vmatprep.subr.bf16.mxu0 %v657_v0  ;;  %p585_p7 = pneg %p584_p3 }
  0x53   : > { %p591_p10 = por %p590_p9, %p589_p8 }
  0x55   : > { %453 = vmatpush3.bf16.msra.mxu0 %v526_v4  ;;  %p592_p5 = pnand %p591_p10, %p585_p7 }
  0x58   : > { %455 = vmatmul.mubr.msk.bf16.vlgmr.msra.gmra.mxu0 %vm264_vm1, %v527_v5 }
 0x118   : > { %v302_v7 = vpop.f32.mrf.mxu0 }
 0x119   : > { %v303_v8 = vadd.f32 %v430_v6, %v302_v7 }
 0x11a   : > { %v456_v9 = vpop.f32.mrf.mxu0 }
 0x11b   : > { %v309_v10 = vmax.f32 %v303_v8, 0.0 }
 0x11c   : > { %v305_v11 = vpop.f32.mrf.mxu0 }
 0x11d   : > { %311 = vst [vmem:[%s213_s29] sm:$0xff] %v309_v10  ;;  %v306_v12 = vadd.f32 %v430_v6, %v305_v11 }
 0x11e   : > { %v457_v13 = vpop.f32.mrf.mxu0 }
 0x11f   : > { %v310_v14 = vmax.f32 %v306_v12, 0.0 }
 0x121   : > { %312 = vst [vmem:[%s213_s29 + $0x8] sm:$0xff] %v310_v14 }
 0x122   : > { %595 = shalt.err (!%p592_p5)
}
 0x123   : > { %s596_s7 = scalar_lea.hbm %s834_s10, 256  ;;  %s600_s26 = scalar_lea.hbm %s880_s3, 512 }
 0x124   : > { %p597_p11 = scmp.ne.s32.totalorder %s834_s10, %s596_s7  ;;  %p601_p13 = scmp.lt.s32.totalorder %s834_s10, %s880_s3 }
 0x125   : > { %p602_p4 = scmp.lt.s32.totalorder %s600_s26, %s596_s7 }
 0x126   : > { %p598_p6 = pnand %p597_p11, %p896_p2 }
 0x127   : > { %p603_p0 = por %p602_p4, %p601_p13 }
 0x128   : > { %p599_p12 = pneg %p598_p6 }
 0x12a   : > { %p604_p1 = pnand %p603_p0, %p599_p12 }
 0x12c   : > { %607 = shalt.err (!%p604_p1)
}
 0x12d   : > { %s660_s20 = smov 128   ;;  %s661_s29 = smov 256  }
 0x12e   : > { %s662_s11 = smov 8  }
 0x12f   : > { %464 = dma.vmem_to_hbm [thread:$0]  (%p896_p2), %s829_s22, 256, %s834_s10, %s314_s19, %s660_s20, %s661_s29, %s662_s11  }
 0x130 PF: > { %s341_s17 = sand.u32 1, %s638_s12   ;;  %p897_p3 = scmp.ne.s32.totalorder %s888_s25, 0 }
 0x131   : > { %p898_p7 = scmp.ge.s32.totalorder %s650_s15, 2  ;;  %s342_s30 = scalar_lea.sflag [#allocation4], %s341_s17 }
 0x133   : > { %p475_p8 = pnand %p898_p7, %p897_p3 }
 0x135   : > { %p476_p9 = pneg %p475_p8 }
 0x137   : > { %633 = dma.done.wait (%p476_p9), %s342_s30, 256  }
 0x138   : > { %635 = vsyncadd (%p476_p9), %s342_s30, 4294967040  ;;  %p17_p10 = scmp.ge.s32.totalorder %s708_s18, 4   ;;  %s899_s12 = smov %s642_s13 }
 0x139   : > { %s900_s13 = smov %s646_s14  ;;  %s901_s14 = smov %s720_s21 }
 0x13a   : > { %s902_s15 = smov %s708_s18  ;;  %19 = sbr.rel (!%p17_p10) target bundleno = 6 (0x6), region = 85 }
 0x13f   :  { %347 = vsyncpa [#allocation3], 1 }
 0x140   :  { %349 = vsyncpa [#allocation3 + $0x1], 1 }
 0x141   :  { %350 = vsyncpa [#allocation6], 1 }
 0x142   :  { %352 = vsyncpa [#allocation6 + $0x1], 1 }
 0x143   :  { %353 = vsyncpa [#allocation4], 1 }
 0x144   :  { %355 = vsyncpa [#allocation4 + $0x1], 1 }

</bundles_post_ra>
